<compile_context>
chip_gen: v6e
topology: v6e:2x2x1
jax: 0.10.0
libtpu: 0.0.40
codegen_flags: <defaults>
</compile_context>

<pallas_src>
import math

import jax
import jax.numpy as jnp
from jax.experimental import pallas as pl
from jax.experimental.pallas import tpu as pltpu

# ----------------------------- config ---------------------------------------
N = 2            # batch
D = 32           # hidden_size
H = 4            # num_attention_heads
DH = D // H      # attention_head_size
DI = 64          # intermediate_size
MAX_V_LEN = 4    # m (video length)
MAX_T_LEN = 4    # config.max_t_len
L = MAX_V_LEN + MAX_T_LEN   # total sequence length
LN_EPS = 1e-12

# bias/LayerNorm slab rows (each param starts at lane 0 of its own row)
_ROW_BQKV, _ROW_BO, _ROW_BI, _ROW_BO2 = 0, 1, 2, 3
_ROW_LN1W, _ROW_LN1B, _ROW_LN2W, _ROW_LN2B = 4, 5, 6, 7


# ----------------------------- kernel ---------------------------------------
def _layer_norm(x, w, b, eps):
    u = jnp.mean(x, axis=-1, keepdims=True)
    xc = x - u
    var = jnp.mean(xc * xc, axis=-1, keepdims=True)
    return w * (xc * jax.lax.rsqrt(var + eps)) + b


def _gelu(x):
    # erf-based gelu, matching the PyTorch reference exactly.
    return x * 0.5 * (1.0 + jax.lax.erf(x / math.sqrt(2.0)))


def bert_layer_kernel(h_ref, bias_ref, wqkv_ref, wo_ref, wi_ref, wo2_ref, b_ref,
                      out_ref):
    h2 = h_ref[...]                          # (N*L, D)  flattened activations
    B = b_ref[...]                           # (8, 128)  bias / LN slab, row-per-param

    b_qkv = B[_ROW_BQKV:_ROW_BQKV + 1, 0:3 * D]   # (1, 96)  [bq | bk | bv]
    b_o   = B[_ROW_BO:_ROW_BO + 1, 0:D]
    b_i   = B[_ROW_BI:_ROW_BI + 1, 0:DI]
    b_o2  = B[_ROW_BO2:_ROW_BO2 + 1, 0:D]
    ln1w  = B[_ROW_LN1W:_ROW_LN1W + 1, 0:D]
    ln1b  = B[_ROW_LN1B:_ROW_LN1B + 1, 0:D]
    ln2w  = B[_ROW_LN2W:_ROW_LN2W + 1, 0:D]
    ln2b  = B[_ROW_LN2B:_ROW_LN2B + 1, 0:D]

    # --- fused Q/K/V projection: one (N*L,32)x(32,96) MXU matmul ---------------
    # TODO(synk): bf16 MXU operands (with f32 accumulation) would cut MXU latency
    # ~3x but risks the 1e-4 parity with the f32 PyTorch reference; kept in f32.
    proj = jnp.dot(h2, wqkv_ref[...], preferred_element_type=jnp.float32) + b_qkv

    # --- head-batched self-attention -------------------------------------------
    # Stack heads along a leading batch axis: (H*N, L, DH), index = head*N + n.
    # Static lane slices + leading-axis concat only (known-safe Mosaic lowerings);
    # the per-head data lives in 8-lane groups, so a lane extract per head is the
    # minimal relayout either way.
    def split_heads(base):
        return jnp.concatenate(
            [proj[:, base + hd * DH: base + (hd + 1) * DH].reshape(N, L, DH)
             for hd in range(H)], axis=0)

    qh = split_heads(0)
    kh = split_heads(D)
    vh = split_heads(2 * D)

    scale = 1.0 / math.sqrt(DH)
    # contract the last dims directly (no explicit kh.T transpose)
    s = jnp.einsum("bqd,bkd->bqk", qh, kh,
                   preferred_element_type=jnp.float32) * scale
    # additive bias comes in head-independent as (N, L, L); broadcast over heads
    # in-kernel (leading-dim broadcast + free leading-dim merge).
    s = s + jnp.broadcast_to(bias_ref[...], (H, N, L, L)).reshape(H * N, L, L)
    # Keep the row-max subtraction: fully masked rows must degrade to uniform
    # weights (matching jax.nn.softmax / the PyTorch reference), not NaN.
    s = s - jnp.max(s, axis=-1, keepdims=True)
    p = jnp.exp(s)
    # TODO(synk): attention dropout omitted (inference / eval semantics)
    # approx=False keeps numerics tight vs the f32 reference; approx=True is a
    # further EUP win if ~1e-3 tolerance is acceptable.
    p = p * pl.reciprocal(jnp.sum(p, axis=-1, keepdims=True), approx=False)
    ctx_h = jnp.einsum("bqk,bkd->bqd", p, vh,
                       preferred_element_type=jnp.float32)   # (H*N, L, DH)
    # merge heads back into lanes: (N*L, D)
    ctx = jnp.concatenate([ctx_h[hd * N:(hd + 1) * N] for hd in range(H)],
                          axis=-1).reshape(N * L, D)

    # --- BertSelfOutput: dense + residual + LayerNorm ---------------------------
    so = jnp.dot(ctx, wo_ref[...], preferred_element_type=jnp.float32) + b_o
    attn_out = _layer_norm(so + h2, ln1w, ln1b, LN_EPS)

    # --- BertIntermediate: dense + gelu -----------------------------------------
    inter = jnp.dot(attn_out, wi_ref[...], preferred_element_type=jnp.float32) + b_i
    inter = _gelu(inter)                      # (N*L, DI)

    # --- BertOutput: dense (wo2 passed untransposed) + residual + LayerNorm -----
    o = jnp.dot(inter, wo2_ref[...], preferred_element_type=jnp.float32) + b_o2
    out_ref[...] = _layer_norm(o + attn_out, ln2w, ln2b, LN_EPS).astype(out_ref.dtype)


# ----------------------------- wrapper ---------------------------------------
def make_pad_shifted_mask_jax(input_mask, max_v_len, max_t_len):
    """input_mask: (N, L) with 1 = valid.  Returns (N, L, L) float mask."""
    n, seq_len = input_mask.shape
    assert max_v_len + max_t_len == seq_len
    rows = jnp.arange(seq_len)[:, None]
    cols = jnp.arange(seq_len)[None, :]
    video_part = cols < max_v_len
    text_part = (rows >= max_v_len) & (cols >= max_v_len) & (cols <= rows)
    shifted = (video_part | text_part).astype(input_mask.dtype)      # (L, L)
    shifted = jnp.broadcast_to(shifted[None], (n, seq_len, seq_len))
    return shifted * input_mask[:, None, :]


def pack_biases(bq, bk, bv, bo, bi, bo2, ln1w, ln1b, ln2w, ln2b):
    """(8, 128) slab; every parameter in its own row starting at lane 0."""
    def row(x):
        return jnp.zeros((1, 128), jnp.float32).at[:, :x.shape[1]].set(x)
    return jnp.concatenate([
        row(jnp.concatenate([bq, bk, bv], axis=1)),   # row 0: fused QKV bias (96)
        row(bo), row(bi), row(bo2),                   # rows 1-3
        row(ln1w), row(ln1b), row(ln2w), row(ln2b),   # rows 4-7
    ], axis=0)


@jax.jit
def bert_layer_no_memory(hidden_states, attention_mask, params):
    """hidden_states: (N, L, D) f32;  attention_mask: (N, L) f32 in {0,1}.

    jit'd end-to-end so the mask build, bias scaling and parameter packing fuse /
    constant-fold instead of running as separate tiny HLOs around the kernel.  If
    params / mask are static across calls, hoist pack_biases + the bias build out
    and close over them.
    """
    (wq, bq, wk, bk, wv, bv, wo, bo, ln1w, ln1b,
     wi, bi, wo2, bo2, ln2w, ln2b) = params
    n, seq_len, d = hidden_states.shape
    shifted = make_pad_shifted_mask_jax(attention_mask, MAX_V_LEN, MAX_T_LEN)
    # head-independent additive bias (N, L, L); heads are broadcast in-kernel
    attn_bias = (1.0 - shifted) * (-10000.0)
    w_qkv = jnp.concatenate([wq, wk, wv], axis=1)          # (D, 3D)
    b_slab = pack_biases(bq, bk, bv, bo, bi, bo2, ln1w, ln1b, ln2w, ln2b)
    h2 = hidden_states.reshape(n * seq_len, d)

    vmem = pl.BlockSpec(memory_space=pltpu.MemorySpace.VMEM)
    # Single invocation (no grid): the whole problem is <100 KB so it lives in VMEM
    # on every TPU generation.  For large N, add a leading 'parallel' grid axis over
    # the flattened rows so v7x's two TensorCores can split the batch.
    out2 = pl.pallas_call(
        bert_layer_kernel,
        out_shape=jax.ShapeDtypeStruct((n * seq_len, d), jnp.float32),
        in_specs=[vmem] * 7,
        out_specs=vmem,
    )(h2, attn_bias, w_qkv, wo, wi, wo2, b_slab)
    return out2.reshape(n, seq_len, d)


# ----------------------------- pure-JAX reference ----------------------------
def reference(hidden_states, attention_mask, params):
    (wq, bq, wk, bk, wv, bv, wo, bo, ln1w, ln1b,
     wi, bi, wo2, bo2, ln2w, ln2b) = params
    mask = make_pad_shifted_mask_jax(attention_mask, MAX_V_LEN, MAX_T_LEN)
    h = hidden_states
    neg = (1.0 - mask[:, None, :, :]) * (-10000.0)                  # (N,1,L,L)

    def proj(x, w, b):
        return x @ w + b[0]

    def heads(x):  # (N,L,D) -> (N,H,L,DH)
        return x.reshape(x.shape[0], x.shape[1], H, DH).transpose(0, 2, 1, 3)

    q, k, v = heads(proj(h, wq, bq)), heads(proj(h, wk, bk)), heads(proj(h, wv, bv))
    s = jnp.einsum("nhqd,nhkd->nhqk", q, k) / math.sqrt(DH) + neg
    p = jax.nn.softmax(s, axis=-1)
    ctx = jnp.einsum("nhqk,nhkd->nhqd", p, v).transpose(0, 2, 1, 3).reshape(h.shape)

    def ln(x, w, b):
        u = x.mean(-1, keepdims=True)
        var = ((x - u) ** 2).mean(-1, keepdims=True)
        return w[0] * ((x - u) / jnp.sqrt(var + LN_EPS)) + b[0]

    attn_out = ln(proj(ctx, wo, bo) + h, ln1w, ln1b)
    inter = proj(attn_out, wi, bi)
    inter = inter * 0.5 * (1.0 + jax.lax.erf(inter / math.sqrt(2.0)))
    return ln(proj(inter, wo2, bo2) + attn_out, ln2w, ln2b)


# ----------------------------- main ------------------------------------------
if __name__ == "__main__":
    key = jax.random.PRNGKey(0)
    keys = jax.random.split(key, 16)

    def init(k, shape, scale=0.05):
        return (scale * jax.random.normal(k, shape)).astype(jnp.float32)

    params = (
        init(keys[0], (D, D)),  init(keys[1], (1, D)),    # query
        init(keys[2], (D, D)),  init(keys[3], (1, D)),    # key
        init(keys[4], (D, D)),  init(keys[5], (1, D)),    # value
        init(keys[6], (D, D)),  init(keys[7], (1, D)),    # self-output dense
        jnp.ones((1, D), jnp.float32), jnp.zeros((1, D), jnp.float32),   # LN1
        init(keys[8], (D, DI)), init(keys[9], (1, DI)),   # intermediate dense
        init(keys[10], (DI, D)), init(keys[11], (1, D)),  # output dense
        jnp.ones((1, D), jnp.float32), jnp.zeros((1, D), jnp.float32),   # LN2
    )

    hidden_states = jax.random.normal(keys[12], (N, L, D), dtype=jnp.float32)
    # attention mask: all valid except the last two text positions of batch 1
    attention_mask = jnp.ones((N, L), dtype=jnp.float32)
    attention_mask = attention_mask.at[1, L - 2:].set(0.0)

    out = bert_layer_no_memory(hidden_states, attention_mask, params)
    out = jax.block_until_ready(out)

    ref = reference(hidden_states, attention_mask, params)
    assert out.shape == (N, L, D)
    assert jnp.all(jnp.isfinite(out))
    assert jnp.allclose(out, ref, atol=1e-4, rtol=1e-4), (
        float(jnp.max(jnp.abs(out - ref))))

    print("KERNEL_OK")
</pallas_src>

<mosaic_0001>
module attributes {stable_mosaic.version = 11 : i64} {
  func.func @bert_layer_kernel(%arg0: memref<16x32xf32, #tpu.memory_space<vmem>>, %arg1: memref<2x8x8xf32, #tpu.memory_space<vmem>>, %arg2: memref<32x96xf32, #tpu.memory_space<vmem>>, %arg3: memref<32x32xf32, #tpu.memory_space<vmem>>, %arg4: memref<32x64xf32, #tpu.memory_space<vmem>>, %arg5: memref<64x32xf32, #tpu.memory_space<vmem>>, %arg6: memref<8x128xf32, #tpu.memory_space<vmem>>, %arg7: memref<16x32xf32, #tpu.memory_space<vmem>>) attributes {dimension_semantics = [], scalar_prefetch = 0 : i64, scratch_operands = 0 : i64, tpu.core_type = #tpu.core_type<tc>} {
    %c0 = arith.constant 0 : index
    %c0_0 = arith.constant 0 : index
    %0 = vector.load %arg0[%c0, %c0_0] : memref<16x32xf32, #tpu.memory_space<vmem>>, vector<16x32xf32>
    %c0_1 = arith.constant 0 : index
    %c0_2 = arith.constant 0 : index
    %1 = vector.load %arg6[%c0_1, %c0_2] : memref<8x128xf32, #tpu.memory_space<vmem>>, vector<8x128xf32>
    %2 = vector.extract_strided_slice %1 {offsets = [0, 0], sizes = [1, 96], strides = [1, 1]} : vector<8x128xf32> to vector<1x96xf32>
    %3 = vector.extract_strided_slice %1 {offsets = [1, 0], sizes = [1, 32], strides = [1, 1]} : vector<8x128xf32> to vector<1x32xf32>
    %4 = vector.extract_strided_slice %1 {offsets = [2, 0], sizes = [1, 64], strides = [1, 1]} : vector<8x128xf32> to vector<1x64xf32>
    %5 = vector.extract_strided_slice %1 {offsets = [3, 0], sizes = [1, 32], strides = [1, 1]} : vector<8x128xf32> to vector<1x32xf32>
    %6 = vector.extract_strided_slice %1 {offsets = [4, 0], sizes = [1, 32], strides = [1, 1]} : vector<8x128xf32> to vector<1x32xf32>
    %7 = vector.extract_strided_slice %1 {offsets = [5, 0], sizes = [1, 32], strides = [1, 1]} : vector<8x128xf32> to vector<1x32xf32>
    %8 = vector.extract_strided_slice %1 {offsets = [6, 0], sizes = [1, 32], strides = [1, 1]} : vector<8x128xf32> to vector<1x32xf32>
    %9 = vector.extract_strided_slice %1 {offsets = [7, 0], sizes = [1, 32], strides = [1, 1]} : vector<8x128xf32> to vector<1x32xf32>
    %c0_3 = arith.constant 0 : index
    %c0_4 = arith.constant 0 : index
    %10 = vector.load %arg2[%c0_3, %c0_4] : memref<32x96xf32, #tpu.memory_space<vmem>>, vector<32x96xf32>
    %cst = arith.constant dense<0.000000e+00> : vector<16x96xf32>
    %11 = tpu.matmul %0, %10, %cst {dimension_numbers = #tpu.dot_dimension_numbers<[1], [0], [0], [1], [0, 0, 1, 1], [], []>} : vector<16x32xf32>, vector<32x96xf32>, vector<16x96xf32> -> vector<16x96xf32>
    %12 = vector.broadcast %2 : vector<1x96xf32> to vector<16x96xf32>
    %13 = arith.addf %11, %12 : vector<16x96xf32>
    %14 = vector.extract_strided_slice %13 {offsets = [0, 0], sizes = [16, 8], strides = [1, 1]} : vector<16x96xf32> to vector<16x8xf32>
    %15 = vector.shape_cast %14 : vector<16x8xf32> to vector<2x8x8xf32>
    %16 = vector.extract_strided_slice %13 {offsets = [0, 8], sizes = [16, 8], strides = [1, 1]} : vector<16x96xf32> to vector<16x8xf32>
    %17 = vector.shape_cast %16 : vector<16x8xf32> to vector<2x8x8xf32>
    %18 = vector.extract_strided_slice %13 {offsets = [0, 16], sizes = [16, 8], strides = [1, 1]} : vector<16x96xf32> to vector<16x8xf32>
    %19 = vector.shape_cast %18 : vector<16x8xf32> to vector<2x8x8xf32>
    %20 = vector.extract_strided_slice %13 {offsets = [0, 24], sizes = [16, 8], strides = [1, 1]} : vector<16x96xf32> to vector<16x8xf32>
    %21 = vector.shape_cast %20 : vector<16x8xf32> to vector<2x8x8xf32>
    %22 = tpu.concatenate %15, %17, %19, %21 in 0 : vector<2x8x8xf32>, vector<2x8x8xf32>, vector<2x8x8xf32>, vector<2x8x8xf32> -> vector<8x8x8xf32>
    %23 = vector.extract_strided_slice %13 {offsets = [0, 32], sizes = [16, 8], strides = [1, 1]} : vector<16x96xf32> to vector<16x8xf32>
    %24 = vector.shape_cast %23 : vector<16x8xf32> to vector<2x8x8xf32>
    %25 = vector.extract_strided_slice %13 {offsets = [0, 40], sizes = [16, 8], strides = [1, 1]} : vector<16x96xf32> to vector<16x8xf32>
    %26 = vector.shape_cast %25 : vector<16x8xf32> to vector<2x8x8xf32>
    %27 = vector.extract_strided_slice %13 {offsets = [0, 48], sizes = [16, 8], strides = [1, 1]} : vector<16x96xf32> to vector<16x8xf32>
    %28 = vector.shape_cast %27 : vector<16x8xf32> to vector<2x8x8xf32>
    %29 = vector.extract_strided_slice %13 {offsets = [0, 56], sizes = [16, 8], strides = [1, 1]} : vector<16x96xf32> to vector<16x8xf32>
    %30 = vector.shape_cast %29 : vector<16x8xf32> to vector<2x8x8xf32>
    %31 = tpu.concatenate %24, %26, %28, %30 in 0 : vector<2x8x8xf32>, vector<2x8x8xf32>, vector<2x8x8xf32>, vector<2x8x8xf32> -> vector<8x8x8xf32>
    %32 = vector.extract_strided_slice %13 {offsets = [0, 64], sizes = [16, 8], strides = [1, 1]} : vector<16x96xf32> to vector<16x8xf32>
    %33 = vector.shape_cast %32 : vector<16x8xf32> to vector<2x8x8xf32>
    %34 = vector.extract_strided_slice %13 {offsets = [0, 72], sizes = [16, 8], strides = [1, 1]} : vector<16x96xf32> to vector<16x8xf32>
    %35 = vector.shape_cast %34 : vector<16x8xf32> to vector<2x8x8xf32>
    %36 = vector.extract_strided_slice %13 {offsets = [0, 80], sizes = [16, 8], strides = [1, 1]} : vector<16x96xf32> to vector<16x8xf32>
    %37 = vector.shape_cast %36 : vector<16x8xf32> to vector<2x8x8xf32>
    %38 = vector.extract_strided_slice %13 {offsets = [0, 88], sizes = [16, 8], strides = [1, 1]} : vector<16x96xf32> to vector<16x8xf32>
    %39 = vector.shape_cast %38 : vector<16x8xf32> to vector<2x8x8xf32>
    %40 = tpu.concatenate %33, %35, %37, %39 in 0 : vector<2x8x8xf32>, vector<2x8x8xf32>, vector<2x8x8xf32>, vector<2x8x8xf32> -> vector<8x8x8xf32>
    "tpu.trace_start"() <{level = 10 : i32, message = "bqd,bkd->bqk"}> : () -> ()
    %cst_5 = arith.constant dense<0.000000e+00> : vector<8x8x8xf32>
    %41 = tpu.matmul %22, %31, %cst_5 {dimension_numbers = #tpu.dot_dimension_numbers<[2], [2], [1], [1], [0, 0, 0, 1, 1, 1], [0], [0]>} : vector<8x8x8xf32>, vector<8x8x8xf32>, vector<8x8x8xf32> -> vector<8x8x8xf32>
    "tpu.trace_stop"() : () -> ()
    %cst_6 = arith.constant 0.353553385 : f32
    %42 = vector.broadcast %cst_6 : f32 to vector<8x8x8xf32>
    %43 = arith.mulf %41, %42 : vector<8x8x8xf32>
    %c0_7 = arith.constant 0 : index
    %c0_8 = arith.constant 0 : index
    %c0_9 = arith.constant 0 : index
    %44 = vector.load %arg1[%c0_7, %c0_8, %c0_9] : memref<2x8x8xf32, #tpu.memory_space<vmem>>, vector<2x8x8xf32>
    %45 = vector.shape_cast %44 : vector<2x8x8xf32> to vector<1x2x8x8xf32>
    %46 = vector.broadcast %45 : vector<1x2x8x8xf32> to vector<4x2x8x8xf32>
    %47 = vector.shape_cast %46 : vector<4x2x8x8xf32> to vector<8x8x8xf32>
    %48 = arith.addf %43, %47 : vector<8x8x8xf32>
    %cst_10 = arith.constant dense<0xFF800000> : vector<8x8xf32>
    %49 = vector.multi_reduction <maximumf>, %48, %cst_10 [2] : vector<8x8x8xf32> to vector<8x8xf32>
    %50 = vector.shape_cast %49 : vector<8x8xf32> to vector<8x8x1xf32>
    %51 = vector.broadcast %50 : vector<8x8x1xf32> to vector<8x8x8xf32>
    %52 = arith.subf %48, %51 : vector<8x8x8xf32>
    %53 = math.exp %52 : vector<8x8x8xf32>
    %cst_11 = arith.constant dense<0.000000e+00> : vector<8x8xf32>
    %54 = vector.multi_reduction <add>, %53, %cst_11 [2] : vector<8x8x8xf32> to vector<8x8xf32>
    %55 = vector.shape_cast %54 : vector<8x8xf32> to vector<8x8x1xf32>
    %56 = tpu.reciprocal %55 : vector<8x8x1xf32> -> vector<8x8x1xf32>
    %57 = vector.broadcast %56 : vector<8x8x1xf32> to vector<8x8x8xf32>
    %58 = arith.mulf %53, %57 : vector<8x8x8xf32>
    "tpu.trace_start"() <{level = 10 : i32, message = "bqk,bkd->bqd"}> : () -> ()
    %cst_12 = arith.constant dense<0.000000e+00> : vector<8x8x8xf32>
    %59 = tpu.matmul %58, %40, %cst_12 {dimension_numbers = #tpu.dot_dimension_numbers<[2], [1], [1], [2], [0, 0, 0, 1, 1, 2], [0], [0]>} : vector<8x8x8xf32>, vector<8x8x8xf32>, vector<8x8x8xf32> -> vector<8x8x8xf32>
    "tpu.trace_stop"() : () -> ()
    %60 = vector.extract_strided_slice %59 {offsets = [0, 0, 0], sizes = [2, 8, 8], strides = [1, 1, 1]} : vector<8x8x8xf32> to vector<2x8x8xf32>
    %61 = vector.extract_strided_slice %59 {offsets = [2, 0, 0], sizes = [2, 8, 8], strides = [1, 1, 1]} : vector<8x8x8xf32> to vector<2x8x8xf32>
    %62 = vector.extract_strided_slice %59 {offsets = [4, 0, 0], sizes = [2, 8, 8], strides = [1, 1, 1]} : vector<8x8x8xf32> to vector<2x8x8xf32>
    %63 = vector.extract_strided_slice %59 {offsets = [6, 0, 0], sizes = [2, 8, 8], strides = [1, 1, 1]} : vector<8x8x8xf32> to vector<2x8x8xf32>
    %64 = tpu.concatenate %60, %61, %62, %63 in 2 : vector<2x8x8xf32>, vector<2x8x8xf32>, vector<2x8x8xf32>, vector<2x8x8xf32> -> vector<2x8x32xf32>
    %65 = vector.shape_cast %64 : vector<2x8x32xf32> to vector<16x32xf32>
    %c0_13 = arith.constant 0 : index
    %c0_14 = arith.constant 0 : index
    %66 = vector.load %arg3[%c0_13, %c0_14] : memref<32x32xf32, #tpu.memory_space<vmem>>, vector<32x32xf32>
    %cst_15 = arith.constant dense<0.000000e+00> : vector<16x32xf32>
    %67 = tpu.matmul %65, %66, %cst_15 {dimension_numbers = #tpu.dot_dimension_numbers<[1], [0], [0], [1], [0, 0, 1, 1], [], []>} : vector<16x32xf32>, vector<32x32xf32>, vector<16x32xf32> -> vector<16x32xf32>
    %68 = vector.broadcast %3 : vector<1x32xf32> to vector<16x32xf32>
    %69 = arith.addf %67, %68 : vector<16x32xf32>
    %70 = arith.addf %69, %0 : vector<16x32xf32>
    %cst_16 = arith.constant dense<0.000000e+00> : vector<16xf32>
    %71 = vector.multi_reduction <add>, %70, %cst_16 [1] : vector<16x32xf32> to vector<16xf32>
    %72 = vector.shape_cast %71 : vector<16xf32> to vector<16x1xf32>
    %cst_17 = arith.constant 3.200000e+01 : f32
    %73 = vector.broadcast %cst_17 : f32 to vector<16x1xf32>
    %74 = arith.divf %72, %73 : vector<16x1xf32>
    %75 = vector.broadcast %74 : vector<16x1xf32> to vector<16x32xf32>
    %76 = arith.subf %70, %75 : vector<16x32xf32>
    %77 = arith.mulf %76, %76 : vector<16x32xf32>
    %cst_18 = arith.constant dense<0.000000e+00> : vector<16xf32>
    %78 = vector.multi_reduction <add>, %77, %cst_18 [1] : vector<16x32xf32> to vector<16xf32>
    %79 = vector.shape_cast %78 : vector<16xf32> to vector<16x1xf32>
    %cst_19 = arith.constant 3.200000e+01 : f32
    %80 = vector.broadcast %cst_19 : f32 to vector<16x1xf32>
    %81 = arith.divf %79, %80 : vector<16x1xf32>
    %cst_20 = arith.constant 9.99999996E-13 : f32
    %82 = vector.broadcast %cst_20 : f32 to vector<16x1xf32>
    %83 = arith.addf %81, %82 : vector<16x1xf32>
    %84 = math.rsqrt %83 : vector<16x1xf32>
    %85 = vector.broadcast %84 : vector<16x1xf32> to vector<16x32xf32>
    %86 = arith.mulf %76, %85 : vector<16x32xf32>
    %87 = vector.broadcast %6 : vector<1x32xf32> to vector<16x32xf32>
    %88 = arith.mulf %87, %86 : vector<16x32xf32>
    %89 = vector.broadcast %7 : vector<1x32xf32> to vector<16x32xf32>
    %90 = arith.addf %88, %89 : vector<16x32xf32>
    %c0_21 = arith.constant 0 : index
    %c0_22 = arith.constant 0 : index
    %91 = vector.load %arg4[%c0_21, %c0_22] : memref<32x64xf32, #tpu.memory_space<vmem>>, vector<32x64xf32>
    %cst_23 = arith.constant dense<0.000000e+00> : vector<16x64xf32>
    %92 = tpu.matmul %90, %91, %cst_23 {dimension_numbers = #tpu.dot_dimension_numbers<[1], [0], [0], [1], [0, 0, 1, 1], [], []>} : vector<16x32xf32>, vector<32x64xf32>, vector<16x64xf32> -> vector<16x64xf32>
    %93 = vector.broadcast %4 : vector<1x64xf32> to vector<16x64xf32>
    %94 = arith.addf %92, %93 : vector<16x64xf32>
    %cst_24 = arith.constant 5.000000e-01 : f32
    %95 = vector.broadcast %cst_24 : f32 to vector<16x64xf32>
    %96 = arith.mulf %94, %95 : vector<16x64xf32>
    %cst_25 = arith.constant 1.41421354 : f32
    %97 = vector.broadcast %cst_25 : f32 to vector<16x64xf32>
    %98 = arith.divf %94, %97 : vector<16x64xf32>
    %99 = math.erf %98 : vector<16x64xf32>
    %cst_26 = arith.constant 1.000000e+00 : f32
    %100 = vector.broadcast %cst_26 : f32 to vector<16x64xf32>
    %101 = arith.addf %100, %99 : vector<16x64xf32>
    %102 = arith.mulf %96, %101 : vector<16x64xf32>
    %c0_27 = arith.constant 0 : index
    %c0_28 = arith.constant 0 : index
    %103 = vector.load %arg5[%c0_27, %c0_28] : memref<64x32xf32, #tpu.memory_space<vmem>>, vector<64x32xf32>
    %cst_29 = arith.constant dense<0.000000e+00> : vector<16x32xf32>
    %104 = tpu.matmul %102, %103, %cst_29 {dimension_numbers = #tpu.dot_dimension_numbers<[1], [0], [0], [1], [0, 0, 1, 1], [], []>} : vector<16x64xf32>, vector<64x32xf32>, vector<16x32xf32> -> vector<16x32xf32>
    %105 = vector.broadcast %5 : vector<1x32xf32> to vector<16x32xf32>
    %106 = arith.addf %104, %105 : vector<16x32xf32>
    %107 = arith.addf %106, %90 : vector<16x32xf32>
    %cst_30 = arith.constant dense<0.000000e+00> : vector<16xf32>
    %108 = vector.multi_reduction <add>, %107, %cst_30 [1] : vector<16x32xf32> to vector<16xf32>
    %109 = vector.shape_cast %108 : vector<16xf32> to vector<16x1xf32>
    %cst_31 = arith.constant 3.200000e+01 : f32
    %110 = vector.broadcast %cst_31 : f32 to vector<16x1xf32>
    %111 = arith.divf %109, %110 : vector<16x1xf32>
    %112 = vector.broadcast %111 : vector<16x1xf32> to vector<16x32xf32>
    %113 = arith.subf %107, %112 : vector<16x32xf32>
    %114 = arith.mulf %113, %113 : vector<16x32xf32>
    %cst_32 = arith.constant dense<0.000000e+00> : vector<16xf32>
    %115 = vector.multi_reduction <add>, %114, %cst_32 [1] : vector<16x32xf32> to vector<16xf32>
    %116 = vector.shape_cast %115 : vector<16xf32> to vector<16x1xf32>
    %cst_33 = arith.constant 3.200000e+01 : f32
    %117 = vector.broadcast %cst_33 : f32 to vector<16x1xf32>
    %118 = arith.divf %116, %117 : vector<16x1xf32>
    %cst_34 = arith.constant 9.99999996E-13 : f32
    %119 = vector.broadcast %cst_34 : f32 to vector<16x1xf32>
    %120 = arith.addf %118, %119 : vector<16x1xf32>
    %121 = math.rsqrt %120 : vector<16x1xf32>
    %122 = vector.broadcast %121 : vector<16x1xf32> to vector<16x32xf32>
    %123 = arith.mulf %113, %122 : vector<16x32xf32>
    %124 = vector.broadcast %8 : vector<1x32xf32> to vector<16x32xf32>
    %125 = arith.mulf %124, %123 : vector<16x32xf32>
    %126 = vector.broadcast %9 : vector<1x32xf32> to vector<16x32xf32>
    %127 = arith.addf %125, %126 : vector<16x32xf32>
    %c0_35 = arith.constant 0 : index
    %c0_36 = arith.constant 0 : index
    %128 = vector.load %arg7[%c0_35, %c0_36] : memref<16x32xf32, #tpu.memory_space<vmem>>, vector<16x32xf32>
    tpu.vector_store %arg7[%c0_35, %c0_36], %127 {strides = array<i32>} : memref<16x32xf32, #tpu.memory_space<vmem>>, vector<16x32xf32>,
    return
  }
}

</mosaic_0001>

<bundles_post_ra>
// kernel: bert_layer_no_memory.1
= control target key start
LH: loop header
LB: loop body
LE: loop exit
PB: predicated region body
PF: predicated region fallthrough
CT: control target
= control target key end

     0   :  { %vm38_vm0 = vcmask 261120   ;;  %s2510_s0 = inlined_call_operand.vmem [shape: f32[16,32], index: 0, kind: input, shape index: {}]   ;;  %s2511_s1 = inlined_call_operand.vmem [shape: f32[2,8,8], index: 1, kind: input, shape index: {}]   ;;  %s2512_s2 = inlined_call_operand.vmem [shape: f32[32,96], index: 2, kind: input, shape index: {}]   ;;  %s2513_s3 = inlined_call_operand.vmem [shape: f32[32,32], index: 3, kind: input, shape index: {}]   ;;  %s2514_s4 = inlined_call_operand.vmem [shape: f32[32,64], index: 4, kind: input, shape index: {}]   ;;  %s2515_s5 = inlined_call_operand.vmem [shape: f32[64,32], index: 5, kind: input, shape index: {}]   ;;  %s2516_s6 = inlined_call_operand.vmem [shape: f32[8,128], index: 6, kind: input, shape index: {}]   ;;  %s2517_s7 = inlined_call_operand.hbm [shape: f32[16,32], index: 7, kind: output, shape index: {}]  }
   0x1   :  { %v33_v0 = vld [vmem:[%s2512_s2 + $0x18] sm:$0xff]  ;;  %v32_v1 = vld [vmem:[%s2512_s2 + $0x10] sm:$0xff]  ;;  %v2234_v2 = vld [vmem:[%s2510_s0] sm:$0xff] }
   0x2   :  { %1963 = vmatprep.subr.mxu1 %v33_v0  ;;  %v31_v3 = vld [vmem:[%s2512_s2 + $0x8] sm:$0xff]  ;;  %1971 = vmatprep.mubr.msk.f32.mxu1 %vm38_vm0, %v2234_v2 }
   0x3   :  { %1964 = vmatpush3.msra.mxu1 %v33_v0 }
   0x4   :  { %12 = vsyncpa [#allocation3], 0  ;;  %1965 = vmatprep.subr.mxu1 %v32_v1  ;;  %v30_v4 = vld [vmem:[%s2512_s2] sm:$0xff]  ;;  %v2247_v5 = vld [vmem:[%s2510_s0 + $0x8] sm:$0xff]  ;;  %v34_v6 = vlaneseq  ;;  %v2173_v12 = vmov 0.0   ;;  %s2174_s0 = smov 112  }
   0x5   :  { %1966 = vmatpush3.msra.mxu1 %v32_v1  ;;  %v2257_v9 = vld [vmem:[%s2516_s6] sm:$0xff]  ;;  %1984 = vmatprep.subr.mxu0 %v2173_v12  ;;  %s2175_s2 = smov 120   ;;  %vm2176_vm1 = vmmov 0   ;;  %s2177_s6 = smov 104   ;;  %vm136_vm2 = vcmask 64512   ;;  %v752_v36 = vld [vmem:[%s2511_s1 + $0x8] sm:$0xff] }
   0x6   :  { %1967 = vmatprep.subr.mxu1 %v31_v3  ;;  %v2251_v7 = vshrl.u32 %v34_v6, 7  ;;  %1986 = vmatprep.mubr.msk.f32.mxu0 %vm2176_vm1, %v2173_v12  ;;  %s2178_s15 = smov 96   ;;  %v751_v31 = vld [vmem:[%s2511_s1] sm:$0xff]  ;;  %s2179_s1 = smov 64   ;;  %vm1483_vm3 = vcmask 130048   ;;  %vm1486_vm4 = vcmask 195584  }
   0x7   :  { %1968 = vmatpush3.msra.mxu1 %v31_v3  ;;  %s2180_s28 = smov 8   ;;  %s2181_s29 = smov 16   ;;  %vm1731_vm5 = vcmask 523264  }
   0x8   :  { %1969 = vmatprep.subr.mxu1 %v30_v4  ;;  %v36_v8 = vsub.s32 0, %v2251_v7  ;;  %s2182_s30 = smov 24  }
   0x9   :  { %1970 = vmatpush3.msra.mxu1 %v30_v4 }
   0xa   :  { %1972 = vmatmul.mubr.msk.f32.vlgmr.msra.gmra.mxu1 %vm38_vm0, %v2247_v5  ;;  %v37_v11 = vrot.slane %v2257_v9, %v36_v8  ;;  %1974 = vmatprep.subr.mxu1 %v2173_v12 }
   0xb   :  { %1976 = vmatprep.mubr.msk.f32.mxu1 %vm2176_vm1, %v2173_v12 }
  0xca   :  { %v1973_v10 = vpop.f32.mrf.mxu1 }
  0xcb   :  { %v2270_v15 = vadd.f32 %v1973_v10, %v37_v11 }
  0xcc   :  { %v111_v13 = vpop.f32.mrf.mxu1 }
  0xcd   :  { %v2262_v14 = vadd.f32 %v111_v13, %v37_v11 }
  0xcf   :  { %126 = vrot.lane.b32.xlu1 %v2262_v14, %s2174_s0  ;;  %122 = vrot.lane.b32.xlu0 %v2262_v14, %s2175_s2 }
  0xd3   :  { %128 = vrot.lane.b32.xlu1 %v2270_v15, %s2174_s0  ;;  %124 = vrot.lane.b32.xlu0 %v2270_v15, %s2175_s2 }
  0xd7   :  { %132 = vrot.lane.b32.xlu1 %v2270_v15, %s2177_s6  ;;  %130 = vrot.lane.b32.xlu0 %v2262_v14, %s2177_s6 }
  0xdb   :  { %211 = vrot.lane.b32.xlu1 %v2270_v15, %s2178_s15  ;;  %134 = vrot.lane.b32.xlu0 %v2262_v14, %s2178_s15 }
 0x141   :  { %v2278_v16 = vpop.permute.xlu1 %126  ;;  %v2280_v17 = vpop.permute.xlu0 %122 }
 0x142   :  { %287 = vrot.lane.b32.xlu0 %v2280_v17, %s2178_s15 }
 0x145   :  { %v2283_v18 = vpop.permute.xlu1 %128  ;;  %v2285_v19 = vpop.permute.xlu0 %124 }
 0x146   :  { %439 = vrot.lane.b32.xlu0 %v2278_v16, %s2178_s15  ;;  %363 = vrot.lane.b32.xlu1 %v2285_v19, %s2178_s15 }
 0x149   :  { %v2289_v20 = vpop.permute.xlu0 %130  ;;  %v2293_v21 = vpop.permute.xlu1 %132 }
 0x14a   :  { %515 = vrot.lane.b32.xlu1 %v2283_v18, %s2178_s15  ;;  %591 = vrot.lane.b32.xlu0 %v2289_v20, %s2178_s15 }
 0x14d   :  { %v135_v22 = vpop.permute.xlu0 %134  ;;  %v212_v23 = vpop.permute.xlu1 %211 }
 0x14e   :  { %667 = vrot.lane.b32.xlu1 %v2293_v21, %s2178_s15  ;;  %1975 = vmatpush3.xpose.msk.msra.mxu1 %vm136_vm2, %v135_v22 }
 0x14f   :  { %1979 = vmatprep.subr.mxu1 %v2173_v12 }
 0x151   :  { %1977 = vmatmul.mubr.msk.f32.vlgmr.msra.gmra.mxu1 %vm136_vm2, %v2262_v14 }
 0x152   :  { %1980 = vmatpush3.xpose.msk.msra.mxu1 %vm136_vm2, %v212_v23  ;;  %1981 = vmatprep.mubr.msk.f32.mxu1 %vm2176_vm1, %v2173_v12 }
 0x153   :  { %1989 = vmatprep.subr.mxu1 %v2173_v12 }
 0x155   :  { %1982 = vmatmul.mubr.msk.f32.vlgmr.msra.gmra.mxu1 %vm136_vm2, %v2270_v15 }
 0x156   :  { %1991 = vmatprep.mubr.msk.f32.mxu1 %vm2176_vm1, %v2173_v12 }
 0x1b4   :  { %v288_v24 = vpop.permute.xlu0 %287 }
 0x1b5   :  { %1985 = vmatpush3.xpose.msk.msra.mxu0 %vm136_vm2, %v288_v24 }
 0x1b6   :  { %1994 = vmatprep.subr.mxu0 %v2173_v12 }
 0x1b8   :  { %v364_v25 = vpop.permute.xlu1 %363  ;;  %1987 = vmatmul.mubr.msk.f32.vlgmr.msra.gmra.mxu0 %vm136_vm2, %v2280_v17  ;;  %v440_v26 = vpop.permute.xlu0 %439 }
 0x1b9   :  { %1990 = vmatpush3.xpose.msk.msra.mxu1 %vm136_vm2, %v364_v25  ;;  %1995 = vmatpush3.xpose.msk.msra.mxu0 %vm136_vm2, %v440_v26 }
 0x1ba   :  { %1996 = vmatprep.mubr.msk.f32.mxu0 %vm2176_vm1, %v2173_v12  ;;  %1999 = vmatprep.subr.mxu1 %v2173_v12 }
 0x1bb   :  { %2004 = vmatprep.subr.mxu0 %v2173_v12 }
 0x1bc   :  { %v516_v27 = vpop.permute.xlu1 %515  ;;  %1992 = vmatmul.mubr.msk.f32.vlgmr.msra.gmra.mxu1 %vm136_vm2, %v2285_v19  ;;  %1997 = vmatmul.mubr.msk.f32.vlgmr.msra.gmra.mxu0 %vm136_vm2, %v2278_v16  ;;  %v592_v28 = vpop.permute.xlu0 %591 }
 0x1bd   :  { %2000 = vmatpush3.xpose.msk.msra.mxu1 %vm136_vm2, %v516_v27  ;;  %2005 = vmatpush3.xpose.msk.msra.mxu0 %vm136_vm2, %v592_v28 }
 0x1be   :  { %2001 = vmatprep.mubr.msk.f32.mxu1 %vm2176_vm1, %v2173_v12  ;;  %2006 = vmatprep.mubr.msk.f32.mxu0 %vm2176_vm1, %v2173_v12 }
 0x1bf   :  { %2009 = vmatprep.subr.mxu1 %v2173_v12  ;;  %2014 = vmatprep.subr.mxu0 %v2173_v12 }
 0x1c0   :  { %v668_v29 = vpop.permute.xlu1 %667  ;;  %2002 = vmatmul.mubr.msk.f32.vlgmr.msra.gmra.mxu1 %vm136_vm2, %v2283_v18  ;;  %2007 = vmatmul.mubr.msk.f32.vlgmr.msra.gmra.mxu0 %vm136_vm2, %v2289_v20 }
 0x1c1   :  { %2010 = vmatpush3.xpose.msk.msra.mxu1 %vm136_vm2, %v668_v29  ;;  %2011 = vmatprep.mubr.msk.f32.mxu1 %vm2176_vm1, %v2173_v12 }
 0x1c2   :  { %2019 = vmatprep.subr.mxu1 %v2173_v12  ;;  %2016 = vmatprep.mubr.msk.f32.mxu0 %vm2176_vm1, %v2173_v12 }
 0x1c4   :  { %2012 = vmatmul.mubr.msk.f32.vlgmr.msra.gmra.mxu1 %vm136_vm2, %v2293_v21 }
 0x1c5   :  { %2021 = vmatprep.mubr.msk.f32.mxu1 %vm2176_vm1, %v2173_v12 }
 0x211   :  { %v207_v30 = vpop.f32.mrf.mxu1 }
 0x212   :  { %v743_v32 = vmul.f32 0.35355338, %v207_v30 }
 0x213   :  { %v1978_v33 = vpop.f32.mrf.mxu1 }
 0x214   :  { %v753_v34 = vadd.f32 %v751_v31, %v743_v32 }
 0x215   :  { %v283_v35 = vpop.f32.mrf.mxu1 }
 0x216   :  { %v744_v37 = vmul.f32 0.35355338, %v283_v35  ;;  %v761_v38 = vsel %vm136_vm2, %v753_v34, -inf }
 0x217   :  { %762 = vmax.xlane.f32.xlu0 %v761_v38  ;;  %v1983_v39 = vpop.f32.mrf.mxu1 }
 0x218   :  { %v754_v40 = vadd.f32 %v752_v36, %v744_v37 }
 0x21a   :  { %v764_v41 = vsel %vm136_vm2, %v754_v40, -inf }
 0x21b   :  { %765 = vmax.xlane.f32.xlu1 %v764_v41 }
 0x278   :  { %v359_v42 = vpop.f32.mrf.mxu0 }
 0x279   :  { %v745_v43 = vmul.f32 0.35355338, %v359_v42 }
 0x27a   :  { %v1988_v44 = vpop.f32.mrf.mxu0 }
 0x27b   :  { %v755_v45 = vadd.f32 %v751_v31, %v745_v43 }
 0x27c   :  { %v435_v46 = vpop.f32.mrf.mxu1  ;;  %v511_v47 = vpop.f32.mrf.mxu0 }
 0x27d   :  { %v746_v48 = vmul.f32 0.35355338, %v435_v46  ;;  %v747_v49 = vmul.f32 0.35355338, %v511_v47  ;;  %v767_v50 = vsel %vm136_vm2, %v755_v45, -inf }
 0x27e   :  { %v1993_v51 = vpop.f32.mrf.mxu1  ;;  %768 = vmax.xlane.f32.xlu0 %v767_v50  ;;  %v1998_v52 = vpop.f32.mrf.mxu0 }
 0x27f   :  { %v756_v53 = vadd.f32 %v752_v36, %v746_v48  ;;  %v757_v54 = vadd.f32 %v751_v31, %v747_v49 }
 0x280   :  { %v587_v55 = vpop.f32.mrf.mxu1  ;;  %v663_v56 = vpop.f32.mrf.mxu0 }
 0x281   :  { %v748_v57 = vmul.f32 0.35355338, %v587_v55  ;;  %v749_v58 = vmul.f32 0.35355338, %v663_v56  ;;  %v770_v59 = vsel %vm136_vm2, %v756_v53, -inf  ;;  %v773_v60 = vsel %vm136_vm2, %v757_v54, -inf }
 0x282   :  { %v2003_v61 = vpop.f32.mrf.mxu1  ;;  %771 = vmax.xlane.f32.xlu0 %v770_v59  ;;  %774 = vmax.xlane.f32.xlu1 %v773_v60  ;;  %v2008_v62 = vpop.f32.mrf.mxu0 }
 0x283   :  { %v758_v63 = vadd.f32 %v752_v36, %v748_v57  ;;  %v759_v0 = vadd.f32 %v751_v31, %v749_v58 }
 0x284   :  { %v739_v1 = vpop.f32.mrf.mxu1 }
 0x285   :  { %v750_v3 = vmul.f32 0.35355338, %v739_v1  ;;  %v776_v4 = vsel %vm136_vm2, %v758_v63, -inf  ;;  %v779_v6 = vsel %vm136_vm2, %v759_v0, -inf }
 0x286   :  { %v2013_v8 = vpop.f32.mrf.mxu1  ;;  %777 = vmax.xlane.f32.xlu0 %v776_v4  ;;  %780 = vmax.xlane.f32.xlu1 %v779_v6 }
 0x287   :  { %v760_v10 = vadd.f32 %v752_v36, %v750_v3 }
 0x289   :  { %v782_v11 = vsel %vm136_vm2, %v760_v10, -inf }
 0x28a   :  { %783 = vmax.xlane.f32.xlu0 %v782_v11 }
 0x297   :  { %849 = vrot.lane.b32.xlu1 %v2262_v14, %s2179_s1 }
 0x29b   :  { %1001 = vrot.lane.b32.xlu1 %v2280_v17, %s2179_s1 }
 0x29f   :  { %1077 = vrot.lane.b32.xlu1 %v2285_v19, %s2179_s1 }
 0x2a0   :  { %925 = vrot.lane.b32.xlu0 %v2270_v15, %s2179_s1  ;;  %v763_v23 = vpop.xlane.xlu0 %762 }
 0x2a1   :  { %v785_v24 = vsub.f32 %v753_v34, %v763_v23 }
 0x2a3   :  { %1229 = vrot.lane.b32.xlu1 %v2283_v18, %s2179_s1  ;;  %v793_v25 = vmul.f32 1.442695, %v785_v24 }
 0x2a4   :  { %1153 = vrot.lane.b32.xlu0 %v2278_v16, %s2179_s1  ;;  %v766_v13 = vpop.xlane.xlu1 %765 }
 0x2a5   :  { %v786_v22 = vsub.f32 %v754_v40, %v766_v13 }
 0x2a7   :  { %v795_v14 = vmul.f32 1.442695, %v786_v22 }
 0x2a9   :  { %2107 = vpow2.f32 %v795_v14 }
 0x2aa   :  { %2109 = vpow2.f32 %v793_v25 }
 0x2b6   :  { %v2370_v17 = vpop.eup %2107 }
 0x2b7   :  { %v812_v19 = vsel %vm136_vm2, %v2370_v17, 0.0  ;;  %v2374_v15 = vpop.eup %2109 }
 0x2b8   :  { %v809_v18 = vsel %vm136_vm2, %v2374_v15, 0.0 }
 0x2c3   :  { %813 = vadd.xlane.f32.xlu0 %v812_v19 }
 0x2c7   :  { %810 = vadd.xlane.f32.xlu1 %v809_v18 }
 0x307   :  { %v769_v16 = vpop.xlane.xlu0 %768 }
 0x308   :  { %v787_v26 = vsub.f32 %v755_v45, %v769_v16 }
 0x30a   :  { %v797_v27 = vmul.f32 1.442695, %v787_v26 }
 0x30b   :  { %v775_v28 = vpop.xlane.xlu1 %774  ;;  %v772_v29 = vpop.xlane.xlu0 %771 }
 0x30c   :  { %2111 = vpow2.f32 %v797_v27  ;;  %v789_v30 = vsub.f32 %v757_v54, %v775_v28  ;;  %v788_v31 = vsub.f32 %v756_v53, %v772_v29 }
 0x30e   :  { %v801_v32 = vmul.f32 1.442695, %v789_v30  ;;  %v799_v33 = vmul.f32 1.442695, %v788_v31 }
 0x30f   :  { %v781_v34 = vpop.xlane.xlu1 %780  ;;  %v778_v35 = vpop.xlane.xlu0 %777 }
 0x310   :  { %2113 = vpow2.f32 %v801_v32  ;;  %v791_v36 = vsub.f32 %v759_v0, %v781_v34  ;;  %v790_v37 = vsub.f32 %v758_v63, %v778_v35  ;;  %v1492_v32 = vld [vmem:[%s2513_s3 + $0x18] sm:$0xff]  ;;  %v1489_v35 = vld [vmem:[%s2513_s3] sm:$0xff] }
 0x311   :  { %2115 = vpow2.f32 %v799_v33  ;;  %v1491_v33 = vld [vmem:[%s2513_s3 + $0x10] sm:$0xff] }
 0x312   :  { %v805_v38 = vmul.f32 1.442695, %v791_v36  ;;  %v803_v39 = vmul.f32 1.442695, %v790_v37 }
 0x313   :  { %v850_v40 = vpop.permute.xlu1 %849  ;;  %v784_v41 = vpop.xlane.xlu0 %783 }
 0x314   :  { %2117 = vpow2.f32 %v805_v38  ;;  %v792_v42 = vsub.f32 %v760_v10, %v784_v41  ;;  %2015 = vmatpush3.msra.mxu0 %v850_v40 }
 0x315   :  { %2119 = vpow2.f32 %v803_v39  ;;  %2024 = vmatprep.subr.mxu0 %v2173_v12 }
 0x316   :  { %v807_v43 = vmul.f32 1.442695, %v792_v42 }
 0x317   :  { %v926_v44 = vpop.permute.xlu0 %925  ;;  %v1002_v57 = vpop.permute.xlu1 %1001 }
 0x318   :  { %2121 = vpow2.f32 %v807_v43  ;;  %2020 = vmatpush3.msra.mxu1 %v926_v44 }
 0x319   :  { %v2112_v45 = vpop.eup %2111  ;;  %2029 = vmatprep.subr.mxu1 %v2173_v12 }
 0x31a   :  { %v815_v46 = vsel %vm136_vm2, %v2112_v45, 0.0 }
 0x31b   :  { %816 = vadd.xlane.f32.xlu1 %v815_v46  ;;  %v1078_v58 = vpop.permute.xlu1 %1077  ;;  %v1154_v59 = vpop.permute.xlu0 %1153 }
 0x31d   :  { %v2114_v47 = vpop.eup %2113 }
 0x31e   :  { %v2116_v48 = vpop.eup %2115  ;;  %v821_v49 = vsel %vm136_vm2, %v2114_v47, 0.0 }
 0x31f   :  { %822 = vadd.xlane.f32.xlu1 %v821_v49  ;;  %v818_v50 = vsel %vm136_vm2, %v2116_v48, 0.0  ;;  %v1230_v60 = vpop.permute.xlu1 %1229 }
 0x320   :  { %819 = vadd.xlane.f32.xlu0 %v818_v50 }
 0x321   :  { %v2118_v51 = vpop.eup %2117 }
 0x322   :  { %v2383_v52 = vpop.eup %2119  ;;  %v827_v53 = vsel %vm136_vm2, %v2118_v51, 0.0 }
 0x323   :  { %828 = vadd.xlane.f32.xlu1 %v827_v53  ;;  %v824_v54 = vsel %vm136_vm2, %v2383_v52, 0.0 }
 0x324   :  { %825 = vadd.xlane.f32.xlu0 %v824_v54 }
 0x325   :  { %v2388_v55 = vpop.eup %2121 }
 0x326   :  { %v830_v56 = vsel %vm136_vm2, %v2388_v55, 0.0 }
 0x328   :  { %831 = vadd.xlane.f32.xlu0 %v830_v56 }
 0x334   :  { %1381 = vrot.lane.b32.xlu1 %v2293_v21, %s2179_s1 }
 0x33e   :  { %1305 = vrot.lane.b32.xlu0 %v2289_v20, %s2179_s1 }
 0x34c   :  { %v814_v61 = vpop.xlane.xlu0 %813 }
 0x34d   :  { %2123 = vrcp.f32 %v814_v61 }
 0x350   :  { %v811_v62 = vpop.xlane.xlu1 %810 }
 0x351   :  { %2125 = vrcp.f32 %v811_v62 }
 0x35a   :  { %v2124_v63 = vpop.eup %2123 }
 0x35b   :  { %v842_v0 = vmul.f32 %v2124_v63, %v2370_v17 }
 0x35d   :  { %2022 = vmatmul.mubr.msk.f32.vlgmr.msra.gmra.mxu1 %vm136_vm2, %v842_v0 }
 0x35e   :  { %v2126_v1 = vpop.eup %2125  ;;  %2030 = vmatpush3.msra.mxu1 %v1078_v58  ;;  %2031 = vmatprep.mubr.msk.f32.mxu1 %vm2176_vm1, %v2173_v12 }
 0x35f   :  { %v841_v20 = vmul.f32 %v2126_v1, %v2374_v15  ;;  %2039 = vmatprep.subr.mxu1 %v2173_v12 }
 0x361   :  { %2017 = vmatmul.mubr.msk.f32.vlgmr.msra.gmra.mxu0 %vm136_vm2, %v841_v20 }
 0x362   :  { %2025 = vmatpush3.msra.mxu0 %v1002_v57  ;;  %2026 = vmatprep.mubr.msk.f32.mxu0 %vm2176_vm1, %v2173_v12 }
 0x363   :  { %2034 = vmatprep.subr.mxu0 %v2173_v12 }
 0x3a4   :  { %v817_v21 = vpop.xlane.xlu1 %816 }
 0x3a5   :  { %2127 = vrcp.f32 %v817_v21 }
 0x3a8   :  { %v823_v3 = vpop.xlane.xlu1 %822 }
 0x3a9   :  { %2129 = vrcp.f32 %v823_v3  ;;  %v820_v4 = vpop.xlane.xlu0 %819 }
 0x3aa   :  { %2131 = vrcp.f32 %v820_v4 }
 0x3ac   :  { %v829_v6 = vpop.xlane.xlu1 %828 }
 0x3ad   :  { %2133 = vrcp.f32 %v829_v6  ;;  %v826_v8 = vpop.xlane.xlu0 %825 }
 0x3ae   :  { %2135 = vrcp.f32 %v826_v8 }
 0x3b0   :  { %v1382_v16 = vpop.permute.xlu1 %1381 }
 0x3b1   :  { %v832_v10 = vpop.xlane.xlu0 %831 }
 0x3b2   :  { %v2128_v11 = vpop.eup %2127  ;;  %2137 = vrcp.f32 %v832_v10 }
 0x3b3   :  { %v843_v13 = vmul.f32 %v2128_v11, %v2112_v45 }
 0x3b5   :  { %2027 = vmatmul.mubr.msk.f32.vlgmr.msra.gmra.mxu0 %vm136_vm2, %v843_v13  ;;  %v1306_v25 = vpop.permute.xlu0 %1305 }
 0x3b6   :  { %v2130_v22 = vpop.eup %2129  ;;  %2035 = vmatpush3.msra.mxu0 %v1154_v59  ;;  %2036 = vmatprep.mubr.msk.f32.mxu0 %vm2176_vm1, %v2173_v12  ;;  %v1495_v59 = vsub.s32 1, %v2251_v7 }
 0x3b7   :  { %v2132_v23 = vpop.eup %2131  ;;  %2044 = vmatprep.subr.mxu0 %v2173_v12  ;;  %v845_v24 = vmul.f32 %v2130_v22, %v2114_v47 }
 0x3b8   :  { %v844_v14 = vmul.f32 %v2132_v23, %v2116_v48 }
 0x3b9   :  { %2037 = vmatmul.mubr.msk.f32.vlgmr.msra.gmra.mxu0 %vm136_vm2, %v845_v24 }
 0x3ba   :  { %v2134_v17 = vpop.eup %2133  ;;  %2032 = vmatmul.mubr.msk.f32.vlgmr.msra.gmra.mxu1 %vm136_vm2, %v844_v14  ;;  %2045 = vmatpush3.msra.mxu0 %v1306_v25  ;;  %v1621_v14 = vld [vmem:[%s2514_s4 + $0x10] sm:$0xff]  ;;  %v1620_v25 = vld [vmem:[%s2514_s4 + $0x8] sm:$0xff] }
 0x3bb   :  { %v2136_v19 = vpop.eup %2135  ;;  %2040 = vmatpush3.msra.mxu1 %v1230_v60  ;;  %2041 = vmatprep.mubr.msk.f32.mxu1 %vm2176_vm1, %v2173_v12  ;;  %v847_v15 = vmul.f32 %v2134_v17, %v2118_v51  ;;  %v1496_v60 = vrot.slane %v2257_v9, %v1495_v59  ;;  %v1619_v17 = vld [vmem:[%s2514_s4] sm:$0xff] }
 0x3bc   :  { %2046 = vmatprep.mubr.msk.f32.mxu0 %vm2176_vm1, %v2173_v12  ;;  %2049 = vmatprep.subr.mxu1 %v2173_v12  ;;  %v846_v18 = vmul.f32 %v2136_v19, %v2383_v52 }
 0x3bd   :  { %2047 = vmatmul.mubr.msk.f32.vlgmr.msra.gmra.mxu0 %vm136_vm2, %v847_v15  ;;  %2054 = vmatprep.subr.mxu0 %v1492_v32 }
 0x3be   :  { %2042 = vmatmul.mubr.msk.f32.vlgmr.msra.gmra.mxu1 %vm136_vm2, %v846_v18  ;;  %2055 = vmatpush3.msra.mxu0 %v1492_v32 }
 0x3bf   :  { %v2138_v26 = vpop.eup %2137  ;;  %2050 = vmatpush3.msra.mxu1 %v1382_v16  ;;  %2051 = vmatprep.mubr.msk.f32.mxu1 %vm2176_vm1, %v2173_v12  ;;  %v1490_v12 = vld [vmem:[%s2513_s3 + $0x8] sm:$0xff] }
 0x3c0   :  { %v848_v27 = vmul.f32 %v2138_v26, %v2388_v55  ;;  %2056 = vmatprep.subr.mxu0 %v1491_v33 }
 0x3c1   :  { %2057 = vmatpush3.msra.mxu0 %v1491_v33 }
 0x3c2   :  { %2052 = vmatmul.mubr.msk.f32.vlgmr.msra.gmra.mxu1 %vm136_vm2, %v848_v27  ;;  %2058 = vmatprep.subr.mxu0 %v1490_v12 }
 0x3c3   :  { %2059 = vmatpush3.msra.mxu0 %v1490_v12 }
 0x3c4   :  { %2060 = vmatprep.subr.mxu0 %v1489_v35 }
 0x3c5   :  { %2061 = vmatpush3.msra.mxu0 %v1489_v35 }
 0x41d   :  { %v997_v28 = vpop.f32.mrf.mxu1 }
 0x41f   :  { %v2023_v29 = vpop.f32.mrf.mxu1 }
 0x420   :  { %v1615_v29 = vsub.s32 5, %v2251_v7 }
 0x421   :  { %v921_v30 = vpop.f32.mrf.mxu0 }
 0x422   :  { %v1616_v33 = vrot.slane %v2257_v9, %v1615_v29  ;;  %v1849_v29 = vsub.s32 7, %v2251_v7 }
 0x423   :  { %v2018_v31 = vpop.f32.mrf.mxu0 }
 0x475   :  { %v1073_v34 = vpop.f32.mrf.mxu0 }
 0x476   :  { %1459 = vrot.lane.b32.xlu0 %v1073_v34, %s2180_s28 }
 0x477   :  { %v2028_v36 = vpop.f32.mrf.mxu0 }
 0x479   :  { %v1225_v37 = vpop.f32.mrf.mxu0 }
 0x47a   :  { %v1149_v38 = vpop.f32.mrf.mxu1  ;;  %1467 = vrot.lane.b32.xlu0 %v1225_v37, %s2181_s29 }
 0x47b   :  { %1461 = vrot.lane.b32.xlu1 %v1149_v38, %s2180_s28  ;;  %v2038_v39 = vpop.f32.mrf.mxu0 }
 0x47c   :  { %v2033_v40 = vpop.f32.mrf.mxu1  ;;  %v1726_v39 = vld [vmem:[%s2515_s5 + $0x38] sm:$0xff] }
 0x47d   :  { %v1377_v41 = vpop.f32.mrf.mxu0  ;;  %2076 = vmatprep.subr.mxu0 %v1726_v39  ;;  %v1725_v40 = vld [vmem:[%s2515_s5 + $0x30] sm:$0xff] }
 0x47e   :  { %v1301_v42 = vpop.f32.mrf.mxu1  ;;  %1475 = vrot.lane.b32.xlu0 %v1377_v41, %s2182_s30  ;;  %v1724_v41 = vld [vmem:[%s2515_s5 + $0x28] sm:$0xff] }
 0x47f   :  { %1469 = vrot.lane.b32.xlu1 %v1301_v42, %s2181_s29  ;;  %v2048_v43 = vpop.f32.mrf.mxu0  ;;  %v1723_v42 = vld [vmem:[%s2515_s5 + $0x20] sm:$0xff] }
 0x480   :  { %v2043_v44 = vpop.f32.mrf.mxu1  ;;  %v1722_v43 = vld [vmem:[%s2515_s5 + $0x18] sm:$0xff] }
 0x481   :  { %v1721_v44 = vld [vmem:[%s2515_s5 + $0x10] sm:$0xff] }
 0x482   :  { %v1453_v45 = vpop.f32.mrf.mxu1 }
 0x483   :  { %1477 = vrot.lane.b32.xlu1 %v1453_v45, %s2182_s30  ;;  %v1720_v45 = vld [vmem:[%s2515_s5 + $0x8] sm:$0xff] }
 0x484   :  { %v2053_v46 = vpop.f32.mrf.mxu1 }
 0x485   :  { %v1719_v46 = vld [vmem:[%s2515_s5] sm:$0xff]  ;;  %s2183_s5 = smov [#allocation2]  }
 0x486   :  { %s1860_s26 = sshll.u32 %s2183_s5, 4  ;;  %s1861_s26 = int_to_ptr.vmem [resolvable:$true] %s1860_s26 }
 0x487   :  { %s2151_s27 = scalar_lea.vmem %s1861_s26, 256  ;;  %p2156_p1 = scmp.lt.s32.totalorder %s1861_s26, %s1861_s26 }
 0x488   :  { %p2152_p0 = scmp.ne.s32.totalorder %s1861_s26, %s2151_s27  ;;  %p2157_p2 = scmp.lt.s32.totalorder %s2151_s27, %s2151_s27 }
 0x48a   :  { %p2158_p3 = por %p2157_p2, %p2156_p1 }
 0x48c   :  { %p2159_p4 = pnand %p2158_p3, %p2152_p0 }
 0x4e8   :  { %v1460_v47 = vpop.permute.xlu0 %1459 }
 0x4e9   :  { %v1481_v50 = vsel %vm136_vm2, %v921_v30, %v1460_v47  ;;  %v1625_v47 = vsub.s32 2, %v2251_v7 }
 0x4ec   :  { %v1468_v48 = vpop.permute.xlu0 %1467 }
 0x4ed   :  { %v1462_v49 = vpop.permute.xlu1 %1461  ;;  %v1484_v51 = vsel %vm1483_vm3, %v1481_v50, %v1468_v48  ;;  %v1626_v48 = vrot.slane %v2257_v9, %v1625_v47 }
 0x4ee   :  { %v1482_v55 = vsel %vm136_vm2, %v997_v28, %v1462_v49  ;;  %v1609_v28 = vsub.s32 4, %v2251_v7 }
 0x4f0   :  { %v1476_v52 = vpop.permute.xlu0 %1475  ;;  %v1610_v30 = vrot.slane %v2257_v9, %v1609_v28  ;;  %v1843_v28 = vsub.s32 6, %v2251_v7 }
 0x4f1   :  { %v1470_v53 = vpop.permute.xlu1 %1469  ;;  %v1487_v54 = vsel %vm1486_vm4, %v1484_v51, %v1476_v52 }
 0x4f2   :  { %2062 = vmatprep.mubr.msk.f32.mxu0 %vm38_vm0, %v1487_v54  ;;  %v1485_v56 = vsel %vm1483_vm3, %v1482_v55, %v1470_v53 }
 0x4f5   :  { %v1478_v57 = vpop.permute.xlu1 %1477 }
 0x4f6   :  { %v1488_v58 = vsel %vm1486_vm4, %v1485_v56, %v1478_v57 }
 0x4f7   :  { %2063 = vmatmul.mubr.msk.f32.vlgmr.msra.gmra.mxu0 %vm38_vm0, %v1488_v58 }
 0x4f8   :  { %2077 = vmatpush3.msra.mxu0 %v1726_v39 }
 0x4f9   :  { %2078 = vmatprep.subr.mxu0 %v1725_v40 }
 0x4fa   :  { %2079 = vmatpush3.msra.mxu0 %v1725_v40 }
 0x4fb   :  { %2080 = vmatprep.subr.mxu0 %v1724_v41 }
 0x4fc   :  { %2081 = vmatpush3.msra.mxu0 %v1724_v41 }
 0x4fd   :  { %2082 = vmatprep.subr.mxu0 %v1723_v42 }
 0x4fe   :  { %2083 = vmatpush3.msra.mxu0 %v1723_v42 }
 0x4ff   :  { %2084 = vmatprep.subr.mxu0 %v1722_v43 }
 0x500   :  { %2085 = vmatpush3.msra.mxu0 %v1722_v43 }
 0x501   :  { %2086 = vmatprep.subr.mxu0 %v1721_v44 }
 0x502   :  { %2087 = vmatpush3.msra.mxu0 %v1721_v44 }
 0x503   :  { %2088 = vmatprep.subr.mxu0 %v1720_v45 }
 0x504   :  { %2089 = vmatpush3.msra.mxu0 %v1720_v45 }
 0x505   :  { %2090 = vmatprep.subr.mxu0 %v1719_v46 }
 0x506   :  { %2091 = vmatpush3.msra.mxu0 %v1719_v46 }
 0x5b7   :  { %v2064_v61 = vpop.f32.mrf.mxu0 }
 0x5b8   :  { %v1575_v62 = vadd.f32 %v2064_v61, %v1496_v60 }
 0x5b9   :  { %v1569_v63 = vpop.f32.mrf.mxu0 }
 0x5ba   :  { %v1570_v0 = vadd.f32 %v1569_v63, %v1496_v60  ;;  %v1579_v1 = vadd.f32 %v1575_v62, %v2247_v5  ;;  %v1729_v63 = vsub.s32 3, %v2251_v7 }
 0x5bc   :  { %v1583_v20 = vsel %vm38_vm0, %v1579_v1, 0.0  ;;  %v1578_v21 = vadd.f32 %v1570_v0, %v2234_v2  ;;  %v1622_v2 = vld [vmem:[%s2514_s4 + $0x18] sm:$0xff]  ;;  %v1730_v0 = vrot.slane %v2257_v9, %v1729_v63 }
 0x5bd   :  { %1584 = vadd.xlane.f32.xlu1 %v1583_v20  ;;  %2065 = vmatprep.subr.mxu1 %v1622_v2 }
 0x5be   :  { %v1580_v3 = vsel %vm38_vm0, %v1578_v21, 0.0  ;;  %2066 = vmatpush3.msra.mxu1 %v1622_v2 }
 0x5bf   :  { %1581 = vadd.xlane.f32.xlu0 %v1580_v3  ;;  %2067 = vmatprep.subr.mxu1 %v1621_v14 }
 0x5c0   :  { %2068 = vmatpush3.msra.mxu1 %v1621_v14 }
 0x5c1   :  { %2069 = vmatprep.subr.mxu1 %v1620_v25 }
 0x5c2   :  { %2070 = vmatpush3.msra.mxu1 %v1620_v25 }
 0x5c3   :  { %2071 = vmatprep.subr.mxu1 %v1619_v17 }
 0x5c4   :  { %2072 = vmatpush3.msra.mxu1 %v1619_v17 }
 0x646   :  { %v1585_v4 = vpop.xlane.xlu1 %1584 }
 0x647   :  { %v1588_v6 = vmul.f32 0.03125, %v1585_v4 }
 0x648   :  { %v1582_v8 = vpop.xlane.xlu0 %1581 }
 0x649   :  { %v1587_v10 = vmul.f32 0.03125, %v1582_v8  ;;  %v1590_v11 = vsub.f32 %v1579_v1, %v1588_v6 }
 0x64b   :  { %v1589_v13 = vsub.f32 %v1578_v21, %v1587_v10  ;;  %v1592_v24 = vmul.f32 %v1590_v11, %v1590_v11 }
 0x64d   :  { %v1591_v22 = vmul.f32 %v1589_v13, %v1589_v13  ;;  %v1596_v5 = vsel %vm38_vm0, %v1592_v24, 0.0 }
 0x64f   :  { %v1593_v23 = vsel %vm38_vm0, %v1591_v22, 0.0 }
 0x650   :  { %1594 = vadd.xlane.f32.xlu0 %v1593_v23 }
 0x654   :  { %1597 = vadd.xlane.f32.xlu0 %v1596_v5 }
 0x6d9   :  { %v1595_v19 = vpop.xlane.xlu0 %1594 }
 0x6da   :  { %v1599_v15 = vmul.f32 0.03125, %v1595_v19 }
 0x6dc   :  { %v1601_v18 = vadd.f32 1e-12, %v1599_v15 }
 0x6dd   :  { %v1598_v16 = vpop.xlane.xlu0 %1597 }
 0x6de   :  { %2139 = vrsqrt.f32 %v1601_v18  ;;  %v1600_v26 = vmul.f32 0.03125, %v1598_v16 }
 0x6e0   :  { %v1602_v27 = vadd.f32 1e-12, %v1600_v26 }
 0x6e2   :  { %2141 = vrsqrt.f32 %v1602_v27 }
 0x6eb   :  { %v2140_v31 = vpop.eup %2139 }
 0x6ec   :  { %v1605_v32 = vmul.f32 %v2140_v31, %v1589_v13 }
 0x6ee   :  { %v1611_v12 = vmul.f32 %v1610_v30, %v1605_v32 }
 0x6ef   :  { %v2142_v34 = vpop.eup %2141 }
 0x6f0   :  { %v1606_v35 = vmul.f32 %v2142_v34, %v1590_v11  ;;  %v1617_v36 = vadd.f32 %v1616_v33, %v1611_v12 }
 0x6f2   :  { %v1612_v37 = vmul.f32 %v1610_v30, %v1606_v35  ;;  %2073 = vmatprep.mubr.msk.f32.mxu1 %vm38_vm0, %v1617_v36  ;;  %v1844_v30 = vrot.slane %v2257_v9, %v1843_v28 }
 0x6f4   :  { %v1618_v38 = vadd.f32 %v1616_v33, %v1612_v37  ;;  %v1850_v33 = vrot.slane %v2257_v9, %v1849_v29 }
 0x6f6   :  { %2074 = vmatmul.mubr.msk.f32.vlgmr.msra.gmra.mxu1 %vm38_vm0, %v1618_v38 }
 0x7b6   :  { %v2075_v49 = vpop.f32.mrf.mxu1 }
 0x7b7   :  { %v1705_v50 = vadd.f32 %v2075_v49, %v1626_v48 }
 0x7b8   :  { %v1699_v51 = vpop.f32.mrf.mxu1 }
 0x7b9   :  { %v1712_v52 = vmul.f32 0.70710677, %v1705_v50  ;;  %v1700_v53 = vadd.f32 %v1699_v51, %v1626_v48  ;;  %v1709_v60 = vmul.f32 0.5, %v1705_v50 }
 0x7bb   :  { %2143 = verf.f32 %v1712_v52  ;;  %v1711_v54 = vmul.f32 0.70710677, %v1700_v53  ;;  %v1708_v58 = vmul.f32 0.5, %v1700_v53 }
 0x7bd   :  { %2145 = verf.f32 %v1711_v54 }
 0x7c8   :  { %v2144_v55 = vpop.eup %2143 }
 0x7c9   :  { %v1716_v57 = vadd.f32 1.0, %v2144_v55 }
 0x7ca   :  { %v2146_v56 = vpop.eup %2145 }
 0x7cb   :  { %v1715_v59 = vadd.f32 1.0, %v2146_v56  ;;  %v1718_v62 = vmul.f32 %v1716_v57, %v1709_v60 }
 0x7cd   :  { %v1717_v61 = vmul.f32 %v1715_v59, %v1708_v58 }
 0x7cf   :  { %2092 = vmatprep.mubr.msk.f32.mxu0 %vm1731_vm5, %v1717_v61 }
 0x7d0   :  { %2093 = vmatmul.mubr.msk.f32.vlgmr.msra.gmra.mxu0 %vm1731_vm5, %v1718_v62 }
 0x890   :  { %v2094_v1 = vpop.f32.mrf.mxu0 }
 0x891   :  { %v1810_v20 = vadd.f32 %v2094_v1, %v1730_v0 }
 0x892   :  { %v1804_v21 = vpop.f32.mrf.mxu0 }
 0x893   :  { %v1805_v3 = vadd.f32 %v1804_v21, %v1730_v0  ;;  %v1814_v4 = vadd.f32 %v1810_v20, %v1618_v38 }
 0x895   :  { %v1818_v6 = vsel %vm38_vm0, %v1814_v4, 0.0  ;;  %v1813_v8 = vadd.f32 %v1805_v3, %v1617_v36 }
 0x896   :  { %1819 = vadd.xlane.f32.xlu0 %v1818_v6 }
 0x897   :  { %v1815_v10 = vsel %vm38_vm0, %v1813_v8, 0.0 }
 0x898   :  { %1816 = vadd.xlane.f32.xlu1 %v1815_v10 }
 0x91f   :  { %v1820_v11 = vpop.xlane.xlu0 %1819 }
 0x920   :  { %v1822_v13 = vmul.f32 0.03125, %v1820_v11 }
 0x921   :  { %v1817_v22 = vpop.xlane.xlu1 %1816 }
 0x922   :  { %v1824_v23 = vsub.f32 %v1814_v4, %v1822_v13  ;;  %v1821_v24 = vmul.f32 0.03125, %v1817_v22 }
 0x924   :  { %v1823_v5 = vsub.f32 %v1813_v8, %v1821_v24  ;;  %v1826_v2 = vmul.f32 %v1824_v23, %v1824_v23 }
 0x926   :  { %v1830_v14 = vsel %vm38_vm0, %v1826_v2, 0.0  ;;  %v1825_v25 = vmul.f32 %v1823_v5, %v1823_v5 }
 0x927   :  { %1831 = vadd.xlane.f32.xlu0 %v1830_v14 }
 0x928   :  { %v1827_v17 = vsel %vm38_vm0, %v1825_v25, 0.0 }
 0x929   :  { %1828 = vadd.xlane.f32.xlu1 %v1827_v17 }
 0x9b0   :  { %v1832_v19 = vpop.xlane.xlu0 %1831 }
 0x9b1   :  { %v1834_v15 = vmul.f32 0.03125, %v1832_v19 }
 0x9b2   :  { %v1829_v18 = vpop.xlane.xlu1 %1828 }
 0x9b3   :  { %v1836_v16 = vadd.f32 1e-12, %v1834_v15  ;;  %v1833_v26 = vmul.f32 0.03125, %v1829_v18 }
 0x9b5   :  { %2147 = vrsqrt.f32 %v1836_v16  ;;  %v1835_v27 = vadd.f32 1e-12, %v1833_v26 }
 0x9b7   :  { %2149 = vrsqrt.f32 %v1835_v27 }
 0x9c2   :  { %v2148_v31 = vpop.eup %2147 }
 0x9c3   :  { %v1840_v32 = vmul.f32 %v2148_v31, %v1824_v23 }
 0x9c4   :  { %v2150_v12 = vpop.eup %2149 }
 0x9c5   :  { %v1839_v34 = vmul.f32 %v2150_v12, %v1823_v5  ;;  %v1846_v35 = vmul.f32 %v1844_v30, %v1840_v32 }
 0x9c7   :  { %v1845_v36 = vmul.f32 %v1844_v30, %v1839_v34  ;;  %v1852_v37 = vadd.f32 %v1850_v33, %v1846_v35 }
 0x9c9   :  { %v1851_v38 = vadd.f32 %v1850_v33, %v1845_v36  ;;  %1854 = vst.msk [vmem:[#allocation2 + $0x8] sm:$0xff] %vm38_vm0, %v1852_v37 }
 0x9cb   :  { %1853 = vst.msk [vmem:[#allocation2] sm:$0xff] %vm38_vm0, %v1851_v38 }
 0x9cc   :  { %2162 = shalt.err (!%p2159_p4)
}
 0x9cd   :  { %s2184_s29 = smov 128  }
 0x9ce   :  { %1866 = dma.vmem_to_hbm [thread:$0]  %s1861_s26, 256, %s2517_s7, [#allocation3], %s2184_s29, %s2184_s29, %s2180_s28  }
 0x9cf   :  { %2171 = dma.done.wait [#allocation3], 256  }
 0x9d0   :  { %2172 = vsyncadd [#allocation3], 4294967040 }
 0x9d1   :  { %1870 = vsyncpa [#allocation3], 1 }

</bundles_post_ra>
